<compile_context>
chip_gen: v6e
topology: v6e:2x2x1
jax: 0.10.0
libtpu: 0.0.40
codegen_flags: <defaults>
</compile_context>

<pallas_src>
import functools

import jax
import jax.numpy as jnp
from jax.experimental import pallas as pl
from jax.experimental.pallas import tpu as pltpu


# ----------------------------------------------------------------------------
# Kernels
# ----------------------------------------------------------------------------
def _ffn_kernel_acc(x_ref, w1_ref, b1_ref, w2_ref, b2_ref, o_ref, acc_ref, *,
                    compute_dtype):
    """d_ff-chunked FFN with an explicit f32 accumulator (non-f32 outputs)."""
    k = pl.program_id(1)

    @pl.when(k == 0)
    def _():
        acc_ref[...] = jnp.zeros_like(acc_ref)

    # First linear (partial d_ff chunk) + bias + ReLU, f32 accumulation.
    h = jnp.dot(x_ref[...].astype(compute_dtype),
                w1_ref[...].astype(compute_dtype),
                preferred_element_type=jnp.float32)
    h = jnp.maximum(h + b1_ref[...].astype(jnp.float32), 0.0)
    # Dropout (eval mode) == identity.
    # Second linear: this chunk's contribution to the output, f32 accumulate.
    acc_ref[...] += jnp.dot(h.astype(compute_dtype),
                            w2_ref[...].astype(compute_dtype),
                            preferred_element_type=jnp.float32)

    @pl.when(k == pl.num_programs(1) - 1)
    def _():
        o_ref[...] = (acc_ref[...] + b2_ref[...].astype(jnp.float32)
                      ).astype(o_ref.dtype)


def _ffn_kernel_out(x_ref, w1_ref, b1_ref, w2_ref, b2_ref, o_ref, *,
                    compute_dtype):
    """d_ff-chunked FFN accumulating directly into the f32 output tile."""
    k = pl.program_id(1)

    @pl.when(k == 0)
    def _():
        # Initialize the resident output tile with b2 (saves a tm*d_model*4B
        # scratch buffer and the final add).
        o_ref[...] = jnp.broadcast_to(b2_ref[...].astype(o_ref.dtype),
                                      o_ref.shape)

    h = jnp.dot(x_ref[...].astype(compute_dtype),
                w1_ref[...].astype(compute_dtype),
                preferred_element_type=jnp.float32)
    h = jnp.maximum(h + b1_ref[...].astype(jnp.float32), 0.0)
    o_ref[...] += jnp.dot(h.astype(compute_dtype),
                          w2_ref[...].astype(compute_dtype),
                          preferred_element_type=jnp.float32)


# ----------------------------------------------------------------------------
# Tiling / budgeting helpers
# ----------------------------------------------------------------------------
def _round_up(x, m):
    return ((x + m - 1) // m) * m


def _round_down(x, m):
    return (x // m) * m


def _tpu_config():
    """Chip-aware targets: (scoped VMEM budget, tm target, tff target, min row tiles)."""
    kind = ""
    try:
        dev = jax.devices()[0]
        if dev.platform == "tpu":
            kind = dev.device_kind.lower()
    except Exception:  # pragma: no cover - fall back to conservative defaults
        pass
    if "v7" in kind:       # 64 MiB VMEM, 2 TCs/chip
        return dict(vmem_cap=56 << 20, tm_target=768, tff_target=256,
                    min_row_tiles=2)
    if "v6" in kind:       # 128 MiB VMEM, worst flops:HBM ratio -> biggest tm
        return dict(vmem_cap=100 << 20, tm_target=1024, tff_target=512,
                    min_row_tiles=1)
    if "v5p" in kind or "v4" in kind:   # megacore chips
        return dict(vmem_cap=100 << 20, tm_target=512, tff_target=512,
                    min_row_tiles=2)
    if "v5" in kind:       # v5e
        return dict(vmem_cap=96 << 20, tm_target=512, tff_target=512,
                    min_row_tiles=1)
    # Unknown: conservative budget.
    return dict(vmem_cap=56 << 20, tm_target=512, tff_target=512,
                min_row_tiles=1)


def _choose_tff(d_ff, target):
    """Largest divisor of d_ff <= target, preferring multiples of 256, then 128."""
    target = max(128, min(target, d_ff))
    for step in (256, 128):
        cand = _round_down(target, step)
        while cand >= step:
            if d_ff % cand == 0:
                return cand
            cand -= step
    return d_ff  # d_ff is asserted to be a multiple of 128, so unreachable


def _choose_tm(M, target, sublane, min_tiles):
    """Row tile + padded M.  Prefers a tile that divides M exactly (no pad)."""
    target = max(sublane, _round_down(target, sublane))
    if min_tiles > 1 and M >= min_tiles * sublane:
        # Keep at least `min_tiles` row tiles so the parallel axis feeds
        # every TensorCore (v7x / megacore).
        target = min(target, max(sublane, _round_down(M // min_tiles, sublane)))
    if M % sublane == 0:
        floor = max(sublane, _round_down(min(target, M) // 2, sublane))
        cand = min(target, M)
        while cand >= floor:
            if M % cand == 0:
                return cand, M            # exact divisor: no pad / slice copies
            cand -= sublane
    tm = min(target, _round_up(M, sublane))
    return tm, _round_up(M, tm)


# ----------------------------------------------------------------------------
# Wrapper
# ----------------------------------------------------------------------------
@functools.partial(jax.jit, static_argnames=("tm", "tff", "compute_dtype"))
def feed_forward(x, w1, b1, w2, b2, *, tm=None, tff=None, compute_dtype=None):
    """FeedForward forward pass (eval-mode dropout == identity).

    x : [batch, seq, d_model]
    w1: [d_model, d_ff]  (PyTorch Linear weight pre-transposed to [in, out])
    b1: [d_ff]
    w2: [d_ff, d_model]
    b2: [d_model]
    """
    batch, seq, d_model = x.shape
    d_ff = w1.shape[1]
    assert d_model % 128 == 0, "d_model must be a multiple of 128 (lane-dense)"
    assert d_ff % 128 == 0, "d_ff must be a multiple of 128"

    x_it = jnp.dtype(x.dtype).itemsize
    w_it = jnp.dtype(w1.dtype).itemsize
    b_it = jnp.dtype(b1.dtype).itemsize
    out_dtype = x.dtype
    out_it = x_it

    # Explicit MXU dtype: low-precision float weights run the MXU in that
    # dtype (f32 accumulation); otherwise stay in the promoted operand dtype.
    if compute_dtype is None:
        if (jnp.issubdtype(w1.dtype, jnp.floating)
                and jnp.dtype(w1.dtype).itemsize <= 2):
            compute_dtype = w1.dtype
        else:
            compute_dtype = jnp.promote_types(x.dtype, w1.dtype)
    compute_dtype = jnp.dtype(compute_dtype)

    use_acc = jnp.dtype(out_dtype) != jnp.dtype(jnp.float32)

    M = batch * seq
    x2d = x.reshape(M, d_model)

    cfg = _tpu_config()
    sublane = max(8, 32 // x_it)          # f32 -> 8, bf16 -> 16, 8-bit -> 32

    # --- d_ff tile (reduction axis) ---
    tff_sel = _choose_tff(d_ff, tff if tff is not None else cfg["tff_target"])

    # --- VMEM budget: shrink tff (cheap dim) first, then cap tm ---
    budget_cap = int(cfg["vmem_cap"] / 1.25)
    per_tm = d_model * (2 * x_it + 2 * out_it + (4 if use_acc else 0))
    while True:
        fixed = 4 * d_model * tff_sel * w_it + 2 * (tff_sel + d_model) * b_it
        avail = budget_cap - fixed
        tm_max = avail // per_tm if avail > 0 else 0
        if tm_max >= sublane or tff_sel <= 128:
            break
        tff_sel = _choose_tff(d_ff, tff_sel - 128)
    tm_max = max(sublane, _round_down(int(tm_max), sublane))

    # --- row tile ---
    if tm is not None:
        tm_sel = max(sublane, min(_round_up(tm, sublane), _round_up(M, sublane)))
        M_pad = _round_up(M, tm_sel)
    else:
        tm_sel, M_pad = _choose_tm(M, min(cfg["tm_target"], tm_max), sublane,
                                   cfg["min_row_tiles"])

    if M_pad != M:
        x2d = jnp.pad(x2d, ((0, M_pad - M), (0, 0)))

    b1_2d = b1.reshape(1, d_ff)
    b2_2d = b2.reshape(1, d_model)

    grid = (M_pad // tm_sel, d_ff // tff_sel)
    n_row_tiles = grid[0]

    # Explicit scoped-VMEM limit derived from the tile budget (with margin).
    fixed = 4 * d_model * tff_sel * w_it + 2 * (tff_sel + d_model) * b_it
    budget = fixed + tm_sel * per_tm
    vmem_limit = int(min(cfg["vmem_cap"],
                         max(int(budget * 1.2) + (2 << 20), 32 << 20)))

    # Advisory cost: weights are re-streamed once per row tile.
    cost = pl.CostEstimate(
        flops=2 * 2 * M_pad * d_model * d_ff,
        transcendentals=0,
        bytes_accessed=(M_pad * d_model * (x_it + out_it)
                        + n_row_tiles * 2 * d_model * d_ff * w_it
                        + n_row_tiles * (d_ff + d_model) * b_it),
    )

    if use_acc:
        kernel = functools.partial(_ffn_kernel_acc, compute_dtype=compute_dtype)
        scratch_shapes = [pltpu.VMEM((tm_sel, d_model), jnp.float32)]
    else:
        kernel = functools.partial(_ffn_kernel_out, compute_dtype=compute_dtype)
        scratch_shapes = []

    out2d = pl.pallas_call(
        kernel,
        out_shape=jax.ShapeDtypeStruct((M_pad, d_model), out_dtype),
        grid_spec=pltpu.PrefetchScalarGridSpec(
            num_scalar_prefetch=0,
            grid=grid,
            in_specs=[
                pl.BlockSpec((tm_sel, d_model), lambda i, k: (i, 0)),     # x tile
                pl.BlockSpec((d_model, tff_sel), lambda i, k: (0, k)),    # W1 col blk
                pl.BlockSpec((1, tff_sel), lambda i, k: (0, k)),          # b1 blk
                pl.BlockSpec((tff_sel, d_model), lambda i, k: (k, 0)),    # W2 row blk
                pl.BlockSpec((1, d_model), lambda i, k: (0, 0)),          # b2
            ],
            out_specs=pl.BlockSpec((tm_sel, d_model), lambda i, k: (i, 0)),
            scratch_shapes=scratch_shapes,
        ),
        compiler_params=pltpu.CompilerParams(
            dimension_semantics=("parallel", "arbitrary"),
            vmem_limit_bytes=vmem_limit),
        cost_estimate=cost,
    )(x2d, w1, b1_2d, w2, b2_2d)

    if M_pad != M:
        out2d = out2d[:M]
    return out2d.reshape(batch, seq, d_model)


def init_feed_forward_params(key, d_model, d_ff, dtype=jnp.float32):
    """Deterministic init matching torch.nn.Linear (uniform +/- 1/sqrt(fan_in)).
    Weights are stored as [in, out] (transposed vs. PyTorch)."""
    k1, k2, k3, k4 = jax.random.split(key, 4)
    bound1 = 1.0 / (d_model ** 0.5)
    bound2 = 1.0 / (d_ff ** 0.5)
    w1 = jax.random.uniform(k1, (d_model, d_ff), dtype, -bound1, bound1)
    b1 = jax.random.uniform(k2, (d_ff,), dtype, -bound1, bound1)
    w2 = jax.random.uniform(k3, (d_ff, d_model), dtype, -bound2, bound2)
    b2 = jax.random.uniform(k4, (d_model,), dtype, -bound2, bound2)
    return w1, b1, w2, b2


if __name__ == "__main__":
    key = jax.random.PRNGKey(0)
    k_x, k_p = jax.random.split(key)

    # Small shapes consistent with the module's forward: [batch, seq, d_model].
    batch, seq, d_model, d_ff = 2, 64, 128, 256
    x = jax.random.normal(k_x, (batch, seq, d_model), jnp.float32)
    w1, b1, w2, b2 = init_feed_forward_params(k_p, d_model, d_ff)

    ref = (jnp.maximum(x.reshape(-1, d_model) @ w1 + b1, 0.0) @ w2 + b2
           ).reshape(batch, seq, d_model)

    # 1) Explicit small tiles -> grid (2, 2): exercises the parallel row axis
    #    and the d_ff-reduction accumulate-into-output (f32) path.
    out = jax.block_until_ready(feed_forward(x, w1, b1, w2, b2, tm=64, tff=128))
    assert out.shape == ref.shape
    assert jnp.allclose(out, ref, atol=1e-4, rtol=1e-4)

    # 2) Chip-aware automatic tile selection must also be exact.
    out_auto = jax.block_until_ready(feed_forward(x, w1, b1, w2, b2))
    assert jnp.allclose(out_auto, ref, atol=1e-4, rtol=1e-4)

    # 3) Ragged M (not a multiple of the row tile) -> internal pad + slice.
    x_odd = x[:, :37, :]
    out_odd = jax.block_until_ready(
        feed_forward(x_odd, w1, b1, w2, b2, tm=64, tff=128))
    ref_odd = (jnp.maximum(x_odd.reshape(-1, d_model) @ w1 + b1, 0.0) @ w2 + b2
               ).reshape(batch, 37, d_model)
    assert jnp.allclose(out_odd, ref_odd, atol=1e-4, rtol=1e-4)

    # 4) bf16 fast path (acc-scratch kernel, bf16 MXU operands, sublane=16).
    xb = x.astype(jnp.bfloat16)
    w1b, b1b, w2b, b2b = (t.astype(jnp.bfloat16) for t in (w1, b1, w2, b2))
    out_bf16 = jax.block_until_ready(feed_forward(xb, w1b, b1b, w2b, b2b))
    hb = jnp.maximum(xb.reshape(-1, d_model).astype(jnp.float32)
                     @ w1b.astype(jnp.float32) + b1b.astype(jnp.float32), 0.0)
    refb = (hb.astype(jnp.bfloat16).astype(jnp.float32)
            @ w2b.astype(jnp.float32) + b2b.astype(jnp.float32)
            ).astype(jnp.bfloat16).reshape(batch, seq, d_model)
    assert jnp.allclose(out_bf16.astype(jnp.float32), refb.astype(jnp.float32),
                        atol=3e-2, rtol=3e-2)

    print("KERNEL_OK")
</pallas_src>

<mosaic_0001>
module attributes {stable_mosaic.version = 11 : i64} {
  func.func @_ffn_kernel_out(%arg0: i32, %arg1: i32, %arg2: memref<64x128xf32, #tpu.memory_space<vmem>>, %arg3: memref<128x128xf32, #tpu.memory_space<vmem>>, %arg4: memref<1x128xf32, #tpu.memory_space<vmem>>, %arg5: memref<128x128xf32, #tpu.memory_space<vmem>>, %arg6: memref<1x128xf32, #tpu.memory_space<vmem>>, %arg7: memref<64x128xf32, #tpu.memory_space<vmem>>) attributes {dimension_semantics = [#tpu.dimension_semantics<parallel>, #tpu.dimension_semantics<arbitrary>], iteration_bounds = array<i64: 2, 2>, scalar_prefetch = 0 : i64, scratch_operands = 0 : i64, tpu.core_type = #tpu.core_type<tc>, window_params = [{transform_indices = @transform_0, window_bounds = array<i64: 64, 128>}, {transform_indices = @transform_1, window_bounds = array<i64: 128, 128>}, {transform_indices = @transform_2, window_bounds = array<i64: 1, 128>}, {transform_indices = @transform_3, window_bounds = array<i64: 128, 128>}, {pipeline_mode = #tpu.pipeline_mode<synchronous>, transform_indices = @transform_4, window_bounds = array<i64: 1, 128>}, {transform_indices = @transform_5, window_bounds = array<i64: 64, 128>}]} {
    %c0_i32 = arith.constant 0 : i32
    %0 = arith.cmpi eq, %arg1, %c0_i32 : i32
    %1 = arith.extui %0 : i1 to i32
    %c0_i32_0 = arith.constant 0 : i32
    %2 = arith.cmpi ne, %1, %c0_i32_0 : i32
    scf.if %2 {
      %c0_14 = arith.constant 0 : index
      %c0_15 = arith.constant 0 : index
      %16 = vector.load %arg6[%c0_14, %c0_15] : memref<1x128xf32, #tpu.memory_space<vmem>>, vector<1x128xf32>
      %17 = vector.shape_cast %16 : vector<1x128xf32> to vector<1x128xf32>
      %18 = vector.broadcast %17 : vector<1x128xf32> to vector<64x128xf32>
      %c0_16 = arith.constant 0 : index
      %c0_17 = arith.constant 0 : index
      %19 = vector.load %arg7[%c0_16, %c0_17] : memref<64x128xf32, #tpu.memory_space<vmem>>, vector<64x128xf32>
      tpu.vector_store %arg7[%c0_16, %c0_17], %18 {strides = array<i32>} : memref<64x128xf32, #tpu.memory_space<vmem>>, vector<64x128xf32>,
    } else {
    }
    %c0 = arith.constant 0 : index
    %c0_1 = arith.constant 0 : index
    %3 = vector.load %arg2[%c0, %c0_1] : memref<64x128xf32, #tpu.memory_space<vmem>>, vector<64x128xf32>
    %c0_2 = arith.constant 0 : index
    %c0_3 = arith.constant 0 : index
    %4 = vector.load %arg3[%c0_2, %c0_3] : memref<128x128xf32, #tpu.memory_space<vmem>>, vector<128x128xf32>
    %cst = arith.constant dense<0.000000e+00> : vector<64x128xf32>
    %5 = tpu.matmul %3, %4, %cst {dimension_numbers = #tpu.dot_dimension_numbers<[1], [0], [0], [1], [0, 0, 1, 1], [], []>} : vector<64x128xf32>, vector<128x128xf32>, vector<64x128xf32> -> vector<64x128xf32>
    %c0_4 = arith.constant 0 : index
    %c0_5 = arith.constant 0 : index
    %6 = vector.load %arg4[%c0_4, %c0_5] : memref<1x128xf32, #tpu.memory_space<vmem>>, vector<1x128xf32>
    %7 = vector.broadcast %6 : vector<1x128xf32> to vector<64x128xf32>
    %8 = arith.addf %5, %7 : vector<64x128xf32>
    %cst_6 = arith.constant 0.000000e+00 : f32
    %9 = vector.broadcast %cst_6 : f32 to vector<64x128xf32>
    %10 = arith.maximumf %8, %9 : vector<64x128xf32>
    %c0_7 = arith.constant 0 : index
    %c0_8 = arith.constant 0 : index
    %11 = vector.load %arg7[%c0_7, %c0_8] : memref<64x128xf32, #tpu.memory_space<vmem>>, vector<64x128xf32>
    %c0_9 = arith.constant 0 : index
    %c0_10 = arith.constant 0 : index
    %12 = vector.load %arg5[%c0_9, %c0_10] : memref<128x128xf32, #tpu.memory_space<vmem>>, vector<128x128xf32>
    %cst_11 = arith.constant dense<0.000000e+00> : vector<64x128xf32>
    %13 = tpu.matmul %10, %12, %cst_11 {dimension_numbers = #tpu.dot_dimension_numbers<[1], [0], [0], [1], [0, 0, 1, 1], [], []>} : vector<64x128xf32>, vector<128x128xf32>, vector<64x128xf32> -> vector<64x128xf32>
    %14 = arith.addf %11, %13 : vector<64x128xf32>
    %c0_12 = arith.constant 0 : index
    %c0_13 = arith.constant 0 : index
    %15 = vector.load %arg7[%c0_12, %c0_13] : memref<64x128xf32, #tpu.memory_space<vmem>>, vector<64x128xf32>
    tpu.vector_store %arg7[%c0_12, %c0_13], %14 {strides = array<i32>} : memref<64x128xf32, #tpu.memory_space<vmem>>, vector<64x128xf32>,
    return
  }
  func.func @transform_0(%arg0: i32, %arg1: i32) -> (i32, i32) {
    %c0_i32 = arith.constant 0 : i32
    %c0_i32_0 = arith.constant 0 : i32
    return %arg0, %c0_i32 : i32, i32
  }
  func.func @transform_1(%arg0: i32, %arg1: i32) -> (i32, i32) {
    %c0_i32 = arith.constant 0 : i32
    %c0_i32_0 = arith.constant 0 : i32
    return %c0_i32, %arg1 : i32, i32
  }
  func.func @transform_2(%arg0: i32, %arg1: i32) -> (i32, i32) {
    %c0_i32 = arith.constant 0 : i32
    %c0_i32_0 = arith.constant 0 : i32
    return %c0_i32, %arg1 : i32, i32
  }
  func.func @transform_3(%arg0: i32, %arg1: i32) -> (i32, i32) {
    %c0_i32 = arith.constant 0 : i32
    %c0_i32_0 = arith.constant 0 : i32
    return %arg1, %c0_i32 : i32, i32
  }
  func.func @transform_4(%arg0: i32, %arg1: i32) -> (i32, i32) {
    %c0_i32 = arith.constant 0 : i32
    %c0_i32_0 = arith.constant 0 : i32
    %c0_i32_1 = arith.constant 0 : i32
    return %c0_i32, %c0_i32_0 : i32, i32
  }
  func.func @transform_5(%arg0: i32, %arg1: i32) -> (i32, i32) {
    %c0_i32 = arith.constant 0 : i32
    %c0_i32_0 = arith.constant 0 : i32
    return %arg0, %c0_i32 : i32, i32
  }
}

</mosaic_0001>

<bundles_post_ra>
// kernel: feed_forward.1
= control target key start
LH: loop header
LB: loop body
LE: loop exit
PB: predicated region body
PF: predicated region fallthrough
CT: control target
= control target key end

     0   :  { %s1711_s0 = inlined_call_operand.hbm [shape: f32[128,128], index: 0, kind: input, shape index: {}]   ;;  %s1712_s1 = inlined_call_operand.hbm [shape: f32[128,256], index: 1, kind: input, shape index: {}]   ;;  %s1713_s2 = inlined_call_operand.vmem [shape: f32[1,256], index: 2, kind: input, shape index: {}]   ;;  %s1714_s3 = inlined_call_operand.hbm [shape: f32[256,128], index: 3, kind: input, shape index: {}]   ;;  %s1715_s4 = inlined_call_operand.vmem [shape: f32[1,128], index: 4, kind: input, shape index: {}]   ;;  %s1716_s5 = inlined_call_operand.hbm [shape: f32[128,128], index: 5, kind: output, shape index: {}]  }
   0x1   :  { %1731 = sst [smem:[#allocation21_spill]] %s1711_s0 }
   0x2   :  { %1732 = sst [smem:[#allocation22_spill]] %s1712_s1 }
   0x3   :  { %1733 = sst [smem:[#allocation23_spill]] %s1715_s4 }
   0x4   :  { %1734 = sst [smem:[#allocation24_spill]] %s1716_s5 }
   0x5   :  { %10 = vsyncpa [#allocation3], 0 }
   0x6   :  { %12 = vsyncpa [#allocation3 + $0x1], 0 }
   0x7   :  { %13 = vsyncpa [#allocation6], 0 }
   0x8   :  { %15 = vsyncpa [#allocation6 + $0x1], 0 }
   0x9   :  { %16 = vsyncpa [#allocation4], 0 }
   0xa   :  { %18 = vsyncpa [#allocation4 + $0x1], 0  ;;  %s1336_s18 = smov 0   ;;  %s1338_s19 = smov 0  }
   0xb   :  { %s1340_s20 = smov 0   ;;  %s1342_s21 = smov 0  }
   0xc   :  { %s1344_s22 = smov 0   ;;  %s1346_s23 = smov 0  }
   0xd   :  { %s1348_s24 = smov 0   ;;  %s1350_s25 = smov 0  }
   0xe   :  { %s1352_s26 = smov 0   ;;  %s1354_s27 = smov 0  }
   0xf   :  { %s1356_s28 = smov 0  }
  0x10 LB: > { %1735 = sst [smem:[#allocation12_spill]] %s1263_s20  ;;  %s33_s29 = sadd.s32 1, %s1287_s26  ;;  %s1295_s28 = sphi %s1356_s28, %s24_s28   ;;  %s1291_s27 = sphi %s1354_s27, %s1770_s27   ;;  %s1287_s26 = sphi %s1352_s26, %s1777_s26   ;;  %s1283_s25 = sphi %s1350_s25, %s1776_s25   ;;  %s1279_s24 = sphi %s1348_s24, %s1775_s24   ;;  %s1275_s23 = sphi %s1346_s23, %s1767_s23   ;;  %s1271_s22 = sphi %s1344_s22, %s1774_s22   ;;  %s1267_s21 = sphi %s1342_s21, %s1773_s21   ;;  %s1263_s20 = sphi %s1340_s20, %s1765_s20   ;;  %s1259_s19 = sphi %s1338_s19, %s1772_s19   ;;  %s1255_s18 = sphi %s1336_s18, %s1771_s18  }
  0x11   : > { %1736 = sst [smem:[#allocation13_spill]] %s1275_s23  ;;  %p51_p0 = scmp.eq.s32.totalorder %s1295_s28, 0 }
  0x12   : > { %1737 = sst [smem:[#allocation14_spill]] %s1283_s25  ;;  %p1393_p1 = scmp.ge.s32.totalorder %s33_s29, 2 }
  0x13   : > { %1738 = sst [smem:[#allocation15_spill]] %s1291_s27  ;;  %s69_s6 = sadd.s32 1, %s1263_s20 }
  0x14   : > { %p76_p2 = scmp.ne.s32.totalorder %s1263_s20, %s1259_s19  ;;  %p82_p3 = scmp.ne.s32.totalorder %s1259_s19, %s1255_s18 }
  0x15   : > { %s1779_s29 = smov (%p1393_p1, %s33_s29), 0  ;;  %p1721_p5 = scmp.lt.s32.totalorder %s1295_s28, 4 }
  0x16   : > { %1740 = sst [smem:[#allocation16_spill]] %s1779_s29  ;;  %p78_p4 = por %p76_p2, %p51_p0 }
  0x17   : > { %s66_s7 = ssub.s32 %s1287_s26, %s1779_s29  ;;  %s229_s8 = sand.u32 1, %s1295_s28  }
  0x18   : > { %p67_p6 = scmp.eq.s32.totalorder %s66_s7, 0  ;;  %s231_s10 = sand.u32 1, %s1263_s20  }
  0x19   : > { %s1416_s11 = sshll.u32 %s231_s10, 7  ;;  %s814_s12 = sshll.u32 %s1287_s26, 7 }
  0x1a   : > { %s1413_s9 = scalar_select %p67_p6, %s1263_s20, %s69_s6  }
  0x1b   : > { %s1742_s1 = sld [smem:[#allocation22_spill]]  ;;  %s233_s16 = scalar_lea.vmem [#allocation5], %s1416_s11 }
  0x1c   : > { %1741 = sst [smem:[#allocation17_spill]] %s1413_s9  ;;  %s239_s17 = sshll.u32 %s233_s16, 4  ;;  %s240_s17 = int_to_ptr.vmem [resolvable:$true] %s239_s17 }
  0x1d   : > { %p1425_p7 = pnand %p1721_p5, %p78_p4  ;;  %p818_p8 = scmp.ge.s32.totalorder %s1295_s28, 1 }
  0x1e   : > { %s1430_s6 = scalar_lea.sflag [#allocation6], %s229_s8  ;;  %s1100_s7 = scalar_lea.vmem %s240_s17, 2048 }
  0x1f   : > { %p1720_p9 = pneg %p1425_p7  ;;  %p1101_p10 = scmp.ne.s32.totalorder %s240_s17, %s1100_s7 }
  0x20   : > { %s1297_s10 = smov [#allocation5]  }
  0x21   : > { %s238_s15 = scalar_lea.hbm %s1742_s1, %s814_s12  ;;  %p1103_p11 = pnand %p1101_p10, %p1720_p9 }
  0x22   : > { %s1105_s12 = sshll.u32 %s1297_s10, 4  ;;  %s1106_s12 = int_to_ptr.vmem [resolvable:$false] %s1105_s12 }
  0x23   : > { %p1104_p12 = pneg %p1103_p11  ;;  %s1107_s13 = scalar_lea.vmem %s1106_s12, 4096 }
  0x24   : > { %p1108_p13 = scmp.lt.s32.totalorder %s240_s17, %s1106_s12  ;;  %p1109_p2 = scmp.lt.s32.totalorder %s1107_s13, %s1100_s7 }
  0x26   : > { %p1110_p4 = por %p1109_p2, %p1108_p13 }
  0x28   : > { %p1111_p6 = pnand %p1110_p4, %p1104_p12 }
  0x2a   : > { %1114 = shalt.err (!%p1111_p6)
}
  0x2b   : > { %s1298_s14 = smov 256   ;;  %s1718_s8 = smov 128  }
  0x2c   : > { %s1722_s16 = smov 8   ;;  %p274_p10 = scmp.lt.s32.totalorder %s1295_s28, 5 }
  0x2d   : > { %984 = dma.hbm_to_vmem [thread:$0]  (!%p1425_p7), %s238_s15, 2048, %s240_s17, %s1430_s6, %s1298_s14, %s1718_s8, %s1722_s16  }
  0x2e   : > { %p1445_p11 = pnand %p818_p8, %p274_p10  ;;  %s1450_s10 = sadd.s32 4294967295, %s1295_s28  }
  0x2f   : > { %s807_s12 = sadd.s32 4294967294, %s1295_s28   ;;  %s36_s13 = sadd.s32 1, %s1291_s27 }
  0x30   : > { %s43_s1 = sadd.s32 1, %s1275_s23  ;;  %s1781_s13 = smov (!%p1393_p1, %s36_s13), %s1291_s27 }
  0x31   : > { %p50_p12 = scmp.ne.s32.totalorder %s1275_s23, %s1271_s22  ;;  %p56_p13 = scmp.ne.s32.totalorder %s1271_s22, %s1267_s21 }
  0x32   : > { %p38_p8 = scmp.ge.s32.totalorder %s1781_s13, 2  ;;  %p57_p2 = scmp.eq.s32.totalorder %s1450_s10, 0 }
  0x33   : > { %p1465_p4 = por %p51_p0, %p50_p12  ;;  %p179_p6 = scmp.eq.s32.totalorder %s1450_s10, 3 }
  0x34   : > { %s1783_s13 = smov (%p38_p8, %s1781_s13), 0  ;;  %p1475_p1 = por %p57_p2, %p56_p13 }
  0x35   : > { %1746 = sst [smem:[#allocation18_spill]] %s1783_s13  ;;  %p1482_p10 = por %p82_p3, %p57_p2 }
  0x36   : > { %s40_s14 = ssub.s32 %s1291_s27, %s1783_s13  ;;  %p1488_p0 = por %p179_p6, %p50_p12 }
  0x37   : > { %p41_p9 = scmp.eq.s32.totalorder %s40_s14, 0  ;;  %p185_p5 = scmp.eq.s32.totalorder %s807_s12, 3 }
  0x38   : > { %s1749_s8 = scalar_select %p1488_p0, 1, 0 }
  0x39   : > { %s208_s16 = sand.u32 1, %s1275_s23   ;;  %s831_s29 = sshll.u32 %s1291_s27, 10 }
  0x3a   : > { %1750 = sst [smem:[#allocation19_spill]] %s1749_s8  ;;  %p1500_p8 = por %p185_p5, %p56_p13 }
  0x3b   : > { %s1495_s9 = scalar_select %p41_p9, %s1275_s23, %s43_s1  }
  0x3c   : > { %s1752_s20 = scalar_select %p1500_p8, 1, 0 }
  0x3d   : > { %1751 = sst [smem:[#allocation20_spill]] %s1495_s9  ;;  %s810_s18 = sshll.u32 %s208_s16, 6 }
  0x3e   : > { %s1753_s0 = sld [smem:[#allocation21_spill]]  ;;  %p1754_p3 = scmp.lt.s32.totalorder %s1295_s28, 4 }
  0x3f   : > { %s212_s12 = scalar_lea.vmem [#allocation2], %s810_s18  ;;  %s209_s14 = scalar_lea.sflag [#allocation3], %s208_s16 }
  0x40   : > { %p1511_p12 = pnand %p1754_p3, %p1465_p4  ;;  %s219_s1 = sshll.u32 %s212_s12, 4  ;;  %s220_s1 = int_to_ptr.vmem [resolvable:$true] %s219_s1 }
  0x41   : > { %s1128_s27 = scalar_lea.vmem %s220_s1, 1024  ;;  %s1301_s9 = smov [#allocation2]  }
  0x42   : > { %p1117_p5 = pneg %p1511_p12  ;;  %p1129_p9 = scmp.ne.s32.totalorder %s220_s1, %s1128_s27 }
  0x43   : > { %s1133_s4 = sshll.u32 %s1301_s9, 4  ;;  %s1134_s4 = int_to_ptr.vmem [resolvable:$false] %s1133_s4 }
  0x44   : > { %s218_s13 = scalar_lea.hbm %s1753_s0, %s831_s29  ;;  %p1131_p13 = pnand %p1129_p9, %p1117_p5 }
  0x45   : > { %s1135_s25 = scalar_lea.vmem %s1134_s4, 2048  ;;  %p1136_p6 = scmp.lt.s32.totalorder %s220_s1, %s1134_s4 }
  0x46   : > { %p1132_p2 = pneg %p1131_p13  ;;  %p1137_p4 = scmp.lt.s32.totalorder %s1135_s25, %s1128_s27 }
  0x48   : > { %p1138_p3 = por %p1137_p4, %p1136_p6 }
  0x4a   : > { %p1139_p8 = pnand %p1138_p3, %p1132_p2 }
  0x4c   : > { %1142 = shalt.err (!%p1139_p8)
}
  0x4d   : > { %s1756_s29 = smov 8   ;;  %s1757_s15 = smov 128  }
  0x4e   : > { %981 = dma.hbm_to_vmem [thread:$0]  (!%p1511_p12), %s218_s13, 1024, %s220_s1, %s209_s14, %s1757_s15, %s1757_s15, %s1756_s29  }
  0x4f   : > { %s832_s16 = sshll.u32 %s1287_s26, 11  ;;  %s259_s18 = scalar_lea.vmem [#allocation7], %s1416_s11 }
  0x50   : > { %s266_s12 = sshll.u32 %s259_s18, 4  ;;  %s265_s4 = scalar_lea.hbm %s1714_s3, %s832_s16  ;;  %s267_s12 = int_to_ptr.vmem [resolvable:$true] %s266_s12 }
  0x51   : > { %s1156_s27 = scalar_lea.vmem %s267_s12, 2048  ;;  %p1758_p8 = pneg %p1425_p7 }
  0x52   : > { %p1157_p5 = scmp.ne.s32.totalorder %s267_s12, %s1156_s27  ;;  %s1302_s8 = smov [#allocation7]  }
  0x53   : > { %s1161_s25 = sshll.u32 %s1302_s8, 4  ;;  %s1162_s25 = int_to_ptr.vmem [resolvable:$false] %s1161_s25 }
  0x54   : > { %p1159_p9 = pnand %p1157_p5, %p1758_p8  ;;  %s1163_s23 = scalar_lea.vmem %s1162_s25, 4096 }
  0x55   : > { %p1164_p2 = scmp.lt.s32.totalorder %s267_s12, %s1162_s25  ;;  %p1165_p12 = scmp.lt.s32.totalorder %s1163_s23, %s1156_s27 }
  0x56   : > { %p1160_p13 = pneg %p1159_p9 }
  0x57   : > { %p1166_p6 = por %p1165_p12, %p1164_p2 }
  0x59   : > { %p1167_p4 = pnand %p1166_p6, %p1160_p13 }
  0x5b   : > { %1170 = shalt.err (!%p1167_p4)
}
  0x5c   : > { %987 = dma.hbm_to_vmem [thread:$0]  (!%p1425_p7), %s265_s4, 2048, %s267_s12, %s1430_s6, %s1757_s15, %s1757_s15, %s1756_s29  }
  0x5d   : > { %278 = sbr.rel (%p1445_p11) target bundleno = 573 (0x23d), region = 40  ;;  %s1539_s0 = sand.u32 (!%p1445_p11), 1, %s1271_s22  }
  0x5e   : > { %s819_s23 = sshll.u32 (!%p1445_p11), %s1539_s0, 6  ;;  %s281_s11 = scalar_lea.sflag (!%p1445_p11), [#allocation3], %s1539_s0 }
  0x5f   : > { %s1543_s13 = scalar_lea.vmem (!%p1445_p11), [#allocation2], %s819_s23 }
  0x62   : > { %1242 = dma.done.wait (%p1475_p1), %s281_s11, 1024  }
  0x63   : > { %1244 = vsyncadd (%p1475_p1), %s281_s11, 4294966272  ;;  %s289_s5 = sand.u32 1, %s1450_s10   ;;  %s291_s6 = sand.u32 1, %s1259_s19  }
  0x64   : > { %s820_s7 = sshll.u32 %s291_s6, 7  ;;  %s290_s1 = scalar_lea.sflag [#allocation6], %s289_s5 }
  0x65   : > { %s1551_s14 = scalar_lea.vmem [#allocation5], %s820_s7 }
  0x66   : > { %1246 = dma.done.wait (%p1482_p10), %s290_s1, 4096  }
  0x67   : > { %1248 = vsyncadd (%p1482_p10), %s290_s1, 4294963200  ;;  %p343_p7 = scmp.lt.s32.totalorder %s1279_s24, 1  ;;  %s1565_s16 = scalar_lea.vmem [#allocation7], %s820_s7 }
  0x68   : > { %s1567_s18 = scalar_lea.vmem [#allocation8], %s819_s23  ;;  %p823_p11 = scmp.ne.s32.totalorder %s1279_s24, 0 }
  0x69   : > { %s1559_s29 = scalar_select %p343_p7, %s1279_s24, 1 }
  0x6a   : > { %351 = sbr.rel (%p823_p11) target bundleno = 117 (0x75), region = 56  ;;  %s1759_s9 = sld [smem:[#allocation23_spill]] (!%p823_p11) }
  0x6b   : > { %s345_s10 = scalar_lea.vmem %s1713_s2, %s1559_s29 }
  0x70   : > { %v824_v0 = vld [vmem:[%s1759_s9] ss:$0 sm:$0xff] }
  0x71   : > { %359 = vst [vmem:[%s1567_s18] sm:$0xff] %v824_v0  ;;  %360 = vst [vmem:[%s1567_s18 + $0x8] sm:$0xff] %v824_v0 }
  0x72   : > { %361 = vst [vmem:[%s1567_s18 + $0x10] sm:$0xff] %v824_v0  ;;  %362 = vst [vmem:[%s1567_s18 + $0x18] sm:$0xff] %v824_v0 }
  0x73   : > { %363 = vst [vmem:[%s1567_s18 + $0x20] sm:$0xff] %v824_v0  ;;  %364 = vst [vmem:[%s1567_s18 + $0x28] sm:$0xff] %v824_v0 }
  0x74   : > { %365 = vst [vmem:[%s1567_s18 + $0x30] sm:$0xff] %v824_v0  ;;  %366 = vst [vmem:[%s1567_s18 + $0x38] sm:$0xff] %v824_v0 }
  0x75 PF: > { %v390_v1 = vld [vmem:[%s1551_s14 + $0x78] sm:$0xff]  ;;  %v389_v2 = vld [vmem:[%s1551_s14 + $0x70] sm:$0xff]  ;;  %v388_v3 = vld [vmem:[%s1551_s14 + $0x68] sm:$0xff]  ;;  %s1760_s27 = sld [smem:[#allocation14_spill]]  ;;  %s670_s23 = sshll.u32 %s1567_s18, 4  ;;  %s1647_s23 = int_to_ptr.vmem [resolvable:$true] %s670_s23 }
  0x76   : > { %882 = vmatprep.subr.mxu0 %v390_v1  ;;  %v387_v4 = vld [vmem:[%s1551_s14 + $0x60] sm:$0xff]  ;;  %v386_v6 = vld [vmem:[%s1551_s14 + $0x58] sm:$0xff]  ;;  %v385_v7 = vld [vmem:[%s1551_s14 + $0x50] sm:$0xff]  ;;  %s1762_s5 = sld [smem:[#allocation24_spill]]  ;;  %s657_s7 = scalar_lea.sflag [#allocation4], %s1539_s0 }
  0x77   : > { %883 = vmatpush3.msra.mxu0 %v390_v1  ;;  %v367_v5 = vld [vmem:[%s1543_s13] sm:$0xff]  ;;  %v534_v8 = vld [vmem:[%s1565_s16 + $0x78] sm:$0xff]  ;;  %v533_v9 = vld [vmem:[%s1565_s16 + $0x70] sm:$0xff]  ;;  %s1171_s1 = scalar_lea.vmem %s1647_s23, 1024 }
  0x78   : > { %884 = vmatprep.subr.mxu0 %v389_v2  ;;  %914 = vmatprep.mubr.f32.mxu0 %v367_v5  ;;  %v384_v10 = vld [vmem:[%s1551_s14 + $0x48] sm:$0xff]  ;;  %v383_v12 = vld [vmem:[%s1551_s14 + $0x40] sm:$0xff]  ;;  %v382_v14 = vld [vmem:[%s1551_s14 + $0x38] sm:$0xff]  ;;  %p1172_p1 = scmp.ne.s32.totalorder %s1647_s23, %s1171_s1 }
  0x79   : > { %885 = vmatpush3.msra.mxu0 %v389_v2  ;;  %926 = vmatprep.subr.mxu1 %v534_v8  ;;  %v532_v11 = vld [vmem:[%s1565_s16 + $0x68] sm:$0xff]  ;;  %v531_v13 = vld [vmem:[%s1565_s16 + $0x60] sm:$0xff]  ;;  %v530_v15 = vld [vmem:[%s1565_s16 + $0x58] sm:$0xff] }
  0x7a   : > { %886 = vmatprep.subr.mxu0 %v388_v3  ;;  %927 = vmatpush3.msra.mxu1 %v534_v8  ;;  %v381_v16 = vld [vmem:[%s1551_s14 + $0x30] sm:$0xff]  ;;  %v380_v18 = vld [vmem:[%s1551_s14 + $0x28] sm:$0xff]  ;;  %v379_v20 = vld [vmem:[%s1551_s14 + $0x20] sm:$0xff]  ;;  %p1173_p10 = pnand %p1172_p1, %p1488_p0 }
  0x7b   : > { %887 = vmatpush3.msra.mxu0 %v388_v3  ;;  %928 = vmatprep.subr.mxu1 %v533_v9  ;;  %v529_v17 = vld [vmem:[%s1565_s16 + $0x50] sm:$0xff]  ;;  %v528_v19 = vld [vmem:[%s1565_s16 + $0x48] sm:$0xff]  ;;  %v527_v21 = vld [vmem:[%s1565_s16 + $0x40] sm:$0xff]  ;;  %s833_s25 = sshll.u32 %s1760_s27, 10 }
  0x7c   : > { %888 = vmatprep.subr.mxu0 %v387_v4  ;;  %929 = vmatpush3.msra.mxu1 %v533_v9  ;;  %v378_v22 = vld [vmem:[%s1551_s14 + $0x18] sm:$0xff]  ;;  %v377_v24 = vld [vmem:[%s1551_s14 + $0x10] sm:$0xff]  ;;  %v376_v26 = vld [vmem:[%s1551_s14 + $0x8] sm:$0xff]  ;;  %s1645_s6 = scalar_lea.hbm %s1762_s5, %s833_s25  ;;  %p1174_p3 = pneg %p1173_p10 }
  0x7d   : > { %889 = vmatpush3.msra.mxu0 %v387_v4  ;;  %930 = vmatprep.subr.mxu1 %v532_v11  ;;  %v526_v23 = vld [vmem:[%s1565_s16 + $0x38] sm:$0xff]  ;;  %v525_v25 = vld [vmem:[%s1565_s16 + $0x30] sm:$0xff]  ;;  %v524_v27 = vld [vmem:[%s1565_s16 + $0x28] sm:$0xff] }
  0x7e   : > { %890 = vmatprep.subr.mxu0 %v386_v6  ;;  %931 = vmatpush3.msra.mxu1 %v532_v11  ;;  %v375_v28 = vld [vmem:[%s1551_s14] sm:$0xff]  ;;  %v368_v30 = vld [vmem:[%s1543_s13 + $0x8] sm:$0xff]  ;;  %v369_v31 = vld [vmem:[%s1543_s13 + $0x10] sm:$0xff]  ;;  %s1303_s14 = smov [#allocation8]  }
  0x7f   : > { %891 = vmatpush3.msra.mxu0 %v386_v6  ;;  %932 = vmatprep.subr.mxu1 %v531_v13  ;;  %v523_v29 = vld [vmem:[%s1565_s16 + $0x20] sm:$0xff]  ;;  %v370_v32 = vld [vmem:[%s1543_s13 + $0x18] sm:$0xff]  ;;  %v372_v34 = vld [vmem:[%s1543_s13 + $0x28] sm:$0xff]  ;;  %s1175_s29 = sshll.u32 %s1303_s14, 4  ;;  %s1176_s29 = int_to_ptr.vmem [resolvable:$false] %s1175_s29 }
  0x80   : > { %892 = vmatprep.subr.mxu0 %v385_v7  ;;  %933 = vmatpush3.msra.mxu1 %v531_v13  ;;  %v371_v33 = vld [vmem:[%s1543_s13 + $0x20] sm:$0xff]  ;;  %v373_v35 = vld [vmem:[%s1543_s13 + $0x30] sm:$0xff]  ;;  %v374_v36 = vld [vmem:[%s1543_s13 + $0x38] sm:$0xff]  ;;  %s1177_s30 = scalar_lea.vmem %s1176_s29, 2048  ;;  %p1178_p5 = scmp.lt.s32.totalorder %s1647_s23, %s1176_s29 }
  0x81   : > { %893 = vmatpush3.msra.mxu0 %v385_v7  ;;  %934 = vmatprep.subr.mxu1 %v530_v15  ;;  %v522_v37 = vld [vmem:[%s1565_s16 + $0x18] sm:$0xff]  ;;  %v521_v38 = vld [vmem:[%s1565_s16 + $0x10] sm:$0xff]  ;;  %v520_v39 = vld [vmem:[%s1565_s16 + $0x8] sm:$0xff]  ;;  %p1179_p8 = scmp.lt.s32.totalorder %s1177_s30, %s1171_s1 }
  0x82   : > { %894 = vmatprep.subr.mxu0 %v384_v10  ;;  %935 = vmatpush3.msra.mxu1 %v530_v15  ;;  %v519_v40 = vld [vmem:[%s1565_s16] sm:$0xff]  ;;  %v512_v2 = vld [vmem:[%s1567_s18 + $0x8] sm:$0xff]  ;;  %v514_v7 = vld [vmem:[%s1567_s18 + $0x18] sm:$0xff] }
  0x83   : > { %895 = vmatpush3.msra.mxu0 %v384_v10  ;;  %936 = vmatprep.subr.mxu1 %v529_v17  ;;  %v825_v41 = vld [vmem:[%s345_s10] ss:$0 sm:$0xff]  ;;  %v513_v10 = vld [vmem:[%s1567_s18 + $0x10] sm:$0xff]  ;;  %v516_v13 = vld [vmem:[%s1567_s18 + $0x28] sm:$0xff]  ;;  %p1180_p9 = por %p1179_p8, %p1178_p5 }
  0x84   : > { %896 = vmatprep.subr.mxu0 %v383_v12  ;;  %937 = vmatpush3.msra.mxu1 %v529_v17  ;;  %v511_v4 = vld [vmem:[%s1567_s18] sm:$0xff] }
  0x85   : > { %897 = vmatpush3.msra.mxu0 %v383_v12  ;;  %938 = vmatprep.subr.mxu1 %v528_v19  ;;  %p1181_p13 = pnand %p1180_p9, %p1174_p3 }
  0x86   : > { %898 = vmatprep.subr.mxu0 %v382_v14  ;;  %939 = vmatpush3.msra.mxu1 %v528_v19  ;;  %v518_v19 = vld [vmem:[%s1567_s18 + $0x38] sm:$0xff] }
  0x87   : > { %899 = vmatpush3.msra.mxu0 %v382_v14  ;;  %940 = vmatprep.subr.mxu1 %v527_v21 }
  0x88   : > { %900 = vmatprep.subr.mxu0 %v381_v16  ;;  %941 = vmatpush3.msra.mxu1 %v527_v21 }
  0x89   : > { %901 = vmatpush3.msra.mxu0 %v381_v16  ;;  %942 = vmatprep.subr.mxu1 %v526_v23  ;;  %v515_v16 = vld [vmem:[%s1567_s18 + $0x20] sm:$0xff] }
  0x8a   : > { %902 = vmatprep.subr.mxu0 %v380_v18  ;;  %943 = vmatpush3.msra.mxu1 %v526_v23 }
  0x8b   : > { %903 = vmatpush3.msra.mxu0 %v380_v18  ;;  %944 = vmatprep.subr.mxu1 %v525_v25 }
  0x8c   : > { %904 = vmatprep.subr.mxu0 %v379_v20  ;;  %945 = vmatpush3.msra.mxu1 %v525_v25 }
  0x8d   : > { %905 = vmatpush3.msra.mxu0 %v379_v20  ;;  %946 = vmatprep.subr.mxu1 %v524_v27 }
  0x8e   : > { %906 = vmatprep.subr.mxu0 %v378_v22  ;;  %947 = vmatpush3.msra.mxu1 %v524_v27 }
  0x8f   : > { %907 = vmatpush3.msra.mxu0 %v378_v22  ;;  %948 = vmatprep.subr.mxu1 %v523_v29  ;;  %v517_v22 = vld [vmem:[%s1567_s18 + $0x30] sm:$0xff] }
  0x90   : > { %908 = vmatprep.subr.mxu0 %v377_v24  ;;  %949 = vmatpush3.msra.mxu1 %v523_v29 }
  0x91   : > { %909 = vmatpush3.msra.mxu0 %v377_v24  ;;  %950 = vmatprep.subr.mxu1 %v522_v37 }
  0x92   : > { %910 = vmatprep.subr.mxu0 %v376_v26  ;;  %951 = vmatpush3.msra.mxu1 %v522_v37 }
  0x93   : > { %911 = vmatpush3.msra.mxu0 %v376_v26  ;;  %952 = vmatprep.subr.mxu1 %v521_v38 }
  0x94   : > { %912 = vmatprep.subr.mxu0 %v375_v28  ;;  %953 = vmatpush3.msra.mxu1 %v521_v38 }
  0x95   : > { %913 = vmatpush3.msra.mxu0 %v375_v28  ;;  %954 = vmatprep.subr.mxu1 %v520_v39 }
  0x96   : > { %915 = vmatmul.mubr.f32.vlgmr.msra.gmra.mxu0 %v368_v30  ;;  %955 = vmatpush3.msra.mxu1 %v520_v39 }
  0x97   : > { %917 = vmatprep.mubr.f32.mxu0 %v369_v31  ;;  %956 = vmatprep.subr.mxu1 %v519_v40 }
  0x98   : > { %957 = vmatpush3.msra.mxu1 %v519_v40 }
  0x9a   : > { %918 = vmatmul.mubr.f32.gmra.mxu0 %v370_v32 }
  0x9b   : > { %920 = vmatprep.mubr.f32.mxu0 %v371_v33 }
  0x9e   : > { %921 = vmatmul.mubr.f32.gmra.mxu0 %v372_v34 }
  0x9f   : > { %923 = vmatprep.mubr.f32.mxu0 %v373_v35 }
  0xa2   : > { %924 = vmatmul.mubr.f32.gmra.mxu0 %v374_v36 }
 0x156   : > { %v916_v42 = vpop.f32.mrf.mxu0 }
 0x157   : > { %v470_v43 = vadd.f32 %v916_v42, %v825_v41 }
 0x158   : > { %v464_v44 = vpop.f32.mrf.mxu0 }
 0x159   : > { %v465_v45 = vadd.f32 %v825_v41, %v464_v44  ;;  %v504_v48 = vmax.f32 %v470_v43, 0.0 }
 0x15a   : > { %v919_v46 = vpop.f32.mrf.mxu0 }
 0x15b   : > { %v503_v47 = vmax.f32 %v465_v45, 0.0  ;;  %v480_v49 = vadd.f32 %v919_v46, %v825_v41 }
 0x15c   : > { %v474_v50 = vpop.f32.mrf.mxu0 }
 0x15d   : > { %v475_v51 = vadd.f32 %v825_v41, %v474_v50  ;;  %958 = vmatprep.mubr.f32.mxu1 %v503_v47  ;;  %v506_v54 = vmax.f32 %v480_v49, 0.0 }
 0x15e   : > { %v922_v52 = vpop.f32.mrf.mxu0  ;;  %959 = vmatmul.mubr.f32.vlgmr.msra.gmra.mxu1 %v504_v48 }
 0x15f   : > { %v505_v53 = vmax.f32 %v475_v51, 0.0  ;;  %v490_v55 = vadd.f32 %v922_v52, %v825_v41 }
 0x160   : > { %v484_v56 = vpop.f32.mrf.mxu0 }
 0x161   : > { %v485_v57 = vadd.f32 %v825_v41, %v484_v56  ;;  %961 = vmatprep.mubr.f32.mxu1 %v505_v53  ;;  %v508_v60 = vmax.f32 %v490_v55, 0.0 }
 0x162   : > { %v925_v58 = vpop.f32.mrf.mxu0  ;;  %962 = vmatmul.mubr.f32.gmra.mxu1 %v506_v54 }
 0x163   : > { %v507_v59 = vmax.f32 %v485_v57, 0.0  ;;  %v500_v61 = vadd.f32 %v925_v58, %v825_v41 }
 0x164   : > { %v494_v62 = vpop.f32.mrf.mxu0 }
 0x165   : > { %v495_v63 = vadd.f32 %v825_v41, %v494_v62  ;;  %964 = vmatprep.mubr.f32.mxu1 %v507_v59  ;;  %v510_v1 = vmax.f32 %v500_v61, 0.0 }
 0x166   : > { %965 = vmatmul.mubr.f32.gmra.mxu1 %v508_v60 }
 0x167   : > { %v509_v0 = vmax.f32 %v495_v63, 0.0 }
 0x169   : > { %967 = vmatprep.mubr.f32.mxu1 %v509_v0 }
 0x16a   : > { %968 = vmatmul.mubr.f32.gmra.mxu1 %v510_v1 }
 0x21e   : > { %v960_v3 = vpop.f32.mrf.mxu1 }
 0x21f   : > { %v641_v5 = vadd.f32 %v960_v3, %v512_v2 }
 0x220   : > { %v601_v6 = vpop.f32.mrf.mxu1 }
 0x221   : > { %649 = vst [vmem:[%s1567_s18 + $0x8] sm:$0xff] %v641_v5  ;;  %v640_v8 = vadd.f32 %v601_v6, %v511_v4 }
 0x222   : > { %v963_v9 = vpop.f32.mrf.mxu1 }
 0x223   : > { %648 = vst [vmem:[%s1567_s18] sm:$0xff] %v640_v8  ;;  %v643_v11 = vadd.f32 %v963_v9, %v514_v7 }
 0x224   : > { %v611_v12 = vpop.f32.mrf.mxu1 }
 0x225   : > { %651 = vst [vmem:[%s1567_s18 + $0x18] sm:$0xff] %v643_v11  ;;  %v642_v14 = vadd.f32 %v611_v12, %v513_v10 }
 0x226   : > { %v966_v15 = vpop.f32.mrf.mxu1 }
 0x227   : > { %650 = vst [vmem:[%s1567_s18 + $0x10] sm:$0xff] %v642_v14  ;;  %v645_v17 = vadd.f32 %v966_v15, %v516_v13 }
 0x228   : > { %v621_v18 = vpop.f32.mrf.mxu1 }
 0x229   : > { %653 = vst [vmem:[%s1567_s18 + $0x28] sm:$0xff] %v645_v17  ;;  %v644_v20 = vadd.f32 %v621_v18, %v515_v16 }
 0x22a   : > { %v969_v21 = vpop.f32.mrf.mxu1 }
 0x22b   : > { %652 = vst [vmem:[%s1567_s18 + $0x20] sm:$0xff] %v644_v20  ;;  %v647_v23 = vadd.f32 %v969_v21, %v518_v19 }
 0x22c   : > { %v631_v24 = vpop.f32.mrf.mxu1 }
 0x22d   : > { %655 = vst [vmem:[%s1567_s18 + $0x38] sm:$0xff] %v647_v23  ;;  %v646_v25 = vadd.f32 %v631_v24, %v517_v22 }
 0x22f   : > { %654 = vst [vmem:[%s1567_s18 + $0x30] sm:$0xff] %v646_v25 }
 0x230   : > { %1184 = shalt.err (!%p1181_p13)
}
 0x231   : > { %s1185_s15 = scalar_lea.hbm %s1645_s6, 1024  ;;  %s1189_s18 = scalar_lea.hbm %s1762_s5, 2048 }
 0x232   : > { %p1186_p2 = scmp.ne.s32.totalorder %s1645_s6, %s1185_s15  ;;  %p1190_p4 = scmp.lt.s32.totalorder %s1645_s6, %s1762_s5 }
 0x233   : > { %p1191_p7 = scmp.lt.s32.totalorder %s1189_s18, %s1185_s15 }
 0x234   : > { %p1187_p12 = pnand %p1186_p2, %p1488_p0 }
 0x235   : > { %p1192_p11 = por %p1191_p7, %p1190_p4 }
 0x236   : > { %p1188_p6 = pneg %p1187_p12 }
 0x238   : > { %p1193_p1 = pnand %p1192_p11, %p1188_p6 }
 0x23a   : > { %1196 = shalt.err (!%p1193_p1)
}
 0x23b   : > { %s1304_s9 = smov 128   ;;  %s1305_s24 = smov 8  }
 0x23c   : > { %976 = dma.vmem_to_hbm [thread:$0]  (%p1488_p0), %s1647_s23, 1024, %s1645_s6, %s657_s7, %s1304_s9, %s1304_s9, %s1305_s24  }
 0x23d PF: > { %p993_p10 = scmp.ge.s32.totalorder %s1295_s28, 2  ;;  %s685_s4 = sand.u32 1, %s1267_s21  }
 0x23e   : > { %p1763_p3 = scmp.ne.s32.totalorder %s1752_s20, 0  ;;  %s686_s27 = scalar_lea.sflag [#allocation4], %s685_s4 }
 0x240   : > { %p989_p5 = pnand %p993_p10, %p1763_p3 }
 0x242   : > { %p990_p8 = pneg %p989_p5 }
 0x244   : > { %1250 = dma.done.wait (%p990_p8), %s686_s27, 1024  }
 0x245   : > { %1252 = vsyncadd (%p990_p8), %s686_s27, 4294966272  ;;  %s24_s28 = sadd.s32 1, %s1295_s28   ;;  %s1764_s25 = sld [smem:[#allocation12_spill]] }
 0x246   : > { %p21_p9 = scmp.ge.s32.totalorder %s24_s28, 6   ;;  %s1765_s20 = sld [smem:[#allocation17_spill]] }
 0x247   : > { %s1766_s0 = sld [smem:[#allocation13_spill]]  ;;  %s1771_s18 = smov %s1259_s19 }
 0x248   : > { %s1767_s23 = sld [smem:[#allocation20_spill]]  ;;  %s1773_s21 = smov %s1271_s22 }
 0x249   : > { %s1768_s8 = sld [smem:[#allocation15_spill]]  ;;  %s1775_s24 = smov %s1287_s26 }
 0x24a   : > { %s1769_s11 = sld [smem:[#allocation16_spill]] }
 0x24b   : > { %s1770_s27 = sld [smem:[#allocation18_spill]]  ;;  %s1772_s19 = smov %s1764_s25 }
 0x24c   :  { %23 = sbr.rel (!%p21_p9) target bundleno = 16 (0x10), region = 116 }
 0x24d   : > { %s1774_s22 = smov %s1766_s0 }
 0x24f   : > { %s1776_s25 = smov %s1768_s8 }
 0x250   : > { %s1777_s26 = smov %s1769_s11 }
 0x251   :  { %691 = vsyncpa [#allocation3], 1 }
 0x252   :  { %693 = vsyncpa [#allocation3 + $0x1], 1 }
 0x253   :  { %694 = vsyncpa [#allocation6], 1 }
 0x254   :  { %696 = vsyncpa [#allocation6 + $0x1], 1 }
 0x255   :  { %697 = vsyncpa [#allocation4], 1 }
 0x256   :  { %699 = vsyncpa [#allocation4 + $0x1], 1 }

</bundles_post_ra>
